<compile_context>
chip_gen: v6e
topology: v6e:2x2x1
jax: 0.10.0
libtpu: 0.0.40
codegen_flags: <defaults>
</compile_context>

<pallas_src>
import jax
import jax.numpy as jnp
import numpy as np
from jax.experimental import pallas as pl
from jax.experimental.pallas import tpu as pltpu

HIDDEN = 32  # fc1/fc2 width from the module definition


# --------------------------------------------------------------------------- #
# Kernel
# --------------------------------------------------------------------------- #
def _mlp_kernel(x_ref, w1_ref, w2_ref, w3_ref, b_ref, o_ref):
    # x_ref:  (rb, g*S)  f32/bf16  g samples interleaved per 128-lane row
    # w1_ref: (g*S, g*H) bf16      block-diag kron(I_g, w1.T)
    # w2_ref: (g*H, g*H) bf16      block-diag kron(I_g, w2.T)
    # w3_ref: (g*H, g*O) bf16      block-diag kron(I_g, w3.T)
    # b_ref:  (3, bw)    f32       rows: [tile(b1,g) | tile(b2,g) | tile(b3,g)]
    # o_ref:  (rb, g*O)  f32       same interleaving as x -> reshapes to (B, O)
    gH = w2_ref.shape[0]
    gO = o_ref.shape[1]

    x = x_ref[...].astype(jnp.bfloat16)         # in-kernel cast (VPU is idle)
    b1 = b_ref[0:1, :gH]                        # biases stay f32
    b2 = b_ref[1:2, :gH]
    b3 = b_ref[2:3, :gO]

    # fc1 + ReLU (bf16 operands, f32 accumulation, f32 epilogue)
    h1 = jnp.dot(x, w1_ref[...], preferred_element_type=jnp.float32)
    h1 = jnp.maximum(h1 + b1, 0.0).astype(jnp.bfloat16)
    # fc2 + ReLU
    h2 = jnp.dot(h1, w2_ref[...], preferred_element_type=jnp.float32)
    h2 = jnp.maximum(h2 + b2, 0.0).astype(jnp.bfloat16)
    # fc3 (no activation)
    out = jnp.dot(h2, w3_ref[...], preferred_element_type=jnp.float32)
    o_ref[...] = (out + b3).astype(o_ref.dtype)


# --------------------------------------------------------------------------- #
# Tiling helpers
# --------------------------------------------------------------------------- #
def _pick_tiling(n_rows, rb_max):
    """Rows-per-step (multiple of 8) and step count.

    Prefers exact tilings of n_rows (no batch padding) with an EVEN number of
    grid steps >= 2 so v7x's two TensorCores both get balanced parallel work.
    """
    rb_max = max(8, (rb_max // 8) * 8)
    if n_rows <= 8:
        return 8, 1                                   # tiny batch: one step

    divs = [d for d in range(8, min(n_rows, rb_max) + 1, 8) if n_rows % d == 0]
    for want_even in (True, False):
        best = None
        for d in divs:
            steps = n_rows // d
            if steps >= 2 and (steps % 2 == 0 or not want_even):
                best = d if best is None else max(best, d)
        if best is not None:
            return best, n_rows // best

    # Fallback (no clean divisor): pad the batch once (rare path).
    steps = max(2, -(-n_rows // rb_max))
    if steps % 2:
        steps += 1
    rb = ((-(-n_rows // steps) + 7) // 8) * 8
    return rb, steps


def _vmem_cap_bytes():
    """Per-generation scoped-VMEM request cap (<=40 MiB on v7x's 64 MiB/TC)."""
    try:
        phys = int(pltpu.get_tpu_info().vmem_capacity_bytes)
    except Exception:
        phys = 64 << 20
    return min((phys * 5) // 8, 48 << 20)


# --------------------------------------------------------------------------- #
# Forward pass
# --------------------------------------------------------------------------- #
def deep_snake_forward(x, params):
    """3-layer MLP forward (fc1-relu-fc2-relu-fc3) in one Pallas kernel.

    x: (B, state_size) float32 (bf16 also accepted — halves read traffic).
    params: PyTorch layout — w1 (H,S), b1 (H,), w2 (H,H), b2 (H,), w3 (O,H),
            b3 (O,).  Returns (B, out_size) float32, same semantics as the
            nn.Module.
    """
    orig_B, S = x.shape
    w1, b1 = params["w1"], params["b1"]
    w2, b2 = params["w2"], params["b2"]
    w3, b3 = params["w3"], params["b3"]
    H = w1.shape[0]
    O = w3.shape[0]

    # --- make the feature dim a divisor (or multiple) of 128 (rare path) -----
    if S <= 128:
        S_pad = S if 128 % S == 0 else 1 << (S - 1).bit_length()
    else:
        S_pad = ((S + 127) // 128) * 128
    if S_pad != S:
        # TODO(synk): feature padding costs one copy pass over x; only hit when
        # state_size is not a power of two <= 128.
        x = jnp.pad(x, ((0, 0), (0, S_pad - S)))
        w1 = jnp.pad(w1, ((0, 0), (0, S_pad - S)))
        S = S_pad

    g = max(1, 128 // S)                  # samples interleaved per 128-lane row
    gS, gH, gO = g * S, g * H, g * O

    # --- block-diagonal ("g-way batched") weights, bf16; biases stay f32 -----
    eye = jnp.eye(g, dtype=jnp.float32)
    w1e = jnp.kron(eye, w1.T).astype(jnp.bfloat16)        # (gS, gH)
    w2e = jnp.kron(eye, w2.T).astype(jnp.bfloat16)        # (gH, gH)
    w3e = jnp.kron(eye, w3.T).astype(jnp.bfloat16)        # (gH, gO)
    bw = max(gH, gO)
    bias = jnp.zeros((3, bw), jnp.float32)
    bias = bias.at[0, :gH].set(jnp.tile(b1.astype(jnp.float32), g))
    bias = bias.at[1, :gH].set(jnp.tile(b2.astype(jnp.float32), g))
    bias = bias.at[2, :gO].set(jnp.tile(b3.astype(jnp.float32), g))

    # --- per-generation tile size / VMEM budget -------------------------------
    cap = _vmem_cap_bytes()
    rpad = lambda n: -(-n // 128) * 128
    per_row = (2 * rpad(gS) * 4            # x block, double-buffered, f32
               + 2 * rpad(gO) * 4          # out block, double-buffered, f32
               + 4 * rpad(gH) * 6)         # h1/h2 (f32 + bf16) with 2x headroom
    fixed = (4 * (w1e.size + w2e.size + w3e.size)   # bf16 slabs, double-buffered
             + 8 * bias.size                        # f32 bias slab
             + (4 << 20))                           # compiler scratch headroom
    rb_max = max(8, (cap - fixed) // per_row)

    n_rows = -(-orig_B // g)
    rb, steps = _pick_tiling(n_rows, rb_max)
    R = rb * steps
    B_pad = R * g
    if B_pad != orig_B:
        x = jnp.pad(x, ((0, B_pad - orig_B), (0, 0)))   # rare path: one copy

    xr = x.reshape(R, gS)                 # free: row-major regrouping, no copy
    vmem_limit = int(min(cap, max(fixed + rb * per_row, 16 << 20)))

    out2 = pl.pallas_call(
        _mlp_kernel,
        out_shape=jax.ShapeDtypeStruct((R, gO), jnp.float32),
        grid_spec=pltpu.PrefetchScalarGridSpec(
            num_scalar_prefetch=0,
            grid=(steps,),
            in_specs=[
                pl.BlockSpec((rb, gS), lambda i: (i, 0)),      # x tile (lane-dense)
                pl.BlockSpec(w1e.shape, lambda i: (0, 0)),     # resident slabs
                pl.BlockSpec(w2e.shape, lambda i: (0, 0)),
                pl.BlockSpec(w3e.shape, lambda i: (0, 0)),
                pl.BlockSpec(bias.shape, lambda i: (0, 0)),
            ],
            out_specs=pl.BlockSpec((rb, gO), lambda i: (i, 0)),
        ),
        compiler_params=pltpu.CompilerParams(
            dimension_semantics=("parallel",),
            vmem_limit_bytes=vmem_limit),
    )(xr, w1e, w2e, w3e, bias)

    out = out2.reshape(B_pad, O)          # free reshape: PyTorch (B, out_size)
    if B_pad != orig_B:
        out = out[:orig_B]
    return out


# --------------------------------------------------------------------------- #
# Params + references
# --------------------------------------------------------------------------- #
def init_params(key, state_size, out_size):
    """nn.Linear-like uniform init, PyTorch layout: W (out, in), b (out,)."""
    ks = jax.random.split(key, 6)

    def lin(kw, kb, fan_in, fan_out):
        bound = 1.0 / np.sqrt(fan_in)
        w = jax.random.uniform(kw, (fan_out, fan_in), jnp.float32, -bound, bound)
        b = jax.random.uniform(kb, (fan_out,), jnp.float32, -bound, bound)
        return w, b

    w1, b1 = lin(ks[0], ks[1], state_size, HIDDEN)
    w2, b2 = lin(ks[2], ks[3], HIDDEN, HIDDEN)
    w3, b3 = lin(ks[4], ks[5], HIDDEN, out_size)
    return {"w1": w1, "b1": b1, "w2": w2, "b2": b2, "w3": w3, "b3": b3}


def reference_f32(x, p):
    """PyTorch-semantics f32 reference."""
    h1 = jnp.maximum(x @ p["w1"].T + p["b1"], 0.0)
    h2 = jnp.maximum(h1 @ p["w2"].T + p["b2"], 0.0)
    return h2 @ p["w3"].T + p["b3"]


def reference_bf16(x, p):
    """Reference matching the kernel's dtype path (bf16 operands, f32 accum,
    f32 biases)."""
    bf, f32 = jnp.bfloat16, jnp.float32
    xb = x.astype(bf)
    w1, w2, w3 = p["w1"].astype(bf), p["w2"].astype(bf), p["w3"].astype(bf)
    h1 = jnp.maximum(jnp.dot(xb, w1.T, preferred_element_type=f32) + p["b1"], 0.0).astype(bf)
    h2 = jnp.maximum(jnp.dot(h1, w2.T, preferred_element_type=f32) + p["b2"], 0.0).astype(bf)
    return jnp.dot(h2, w3.T, preferred_element_type=f32) + p["b3"]


# --------------------------------------------------------------------------- #
# Demo
# --------------------------------------------------------------------------- #
if __name__ == "__main__":
    state_size = 16   # flattened snake-state features
    out_size = 4      # Q-values for 4 actions
    batch = 256       # small demo batch -> grid=(2,), 2 balanced parallel steps

    key = jax.random.PRNGKey(0)
    kx, kp = jax.random.split(key)
    x = jax.random.normal(kx, (batch, state_size), jnp.float32)
    params = init_params(kp, state_size, out_size)

    fwd = jax.jit(deep_snake_forward)
    out = jax.block_until_ready(fwd(x, params))
    assert out.shape == (batch, out_size)

    ref_bf = jax.block_until_ready(reference_bf16(x, params))
    np.testing.assert_allclose(np.asarray(out), np.asarray(ref_bf),
                               rtol=2e-3, atol=2e-3)
    ref_f32 = jax.block_until_ready(reference_f32(x, params))
    np.testing.assert_allclose(np.asarray(out), np.asarray(ref_f32),
                               rtol=6e-2, atol=6e-2)
    print("KERNEL_OK")
</pallas_src>

<mosaic_0001>
module attributes {stable_mosaic.version = 11 : i64} {
  func.func @_mlp_kernel(%arg0: i32, %arg1: memref<16x128xf32, #tpu.memory_space<vmem>>, %arg2: memref<128x256xbf16, #tpu.memory_space<vmem>>, %arg3: memref<256x256xbf16, #tpu.memory_space<vmem>>, %arg4: memref<256x32xbf16, #tpu.memory_space<vmem>>, %arg5: memref<3x256xf32, #tpu.memory_space<vmem>>, %arg6: memref<16x32xf32, #tpu.memory_space<vmem>>) attributes {dimension_semantics = [#tpu.dimension_semantics<parallel>], iteration_bounds = array<i64: 2>, scalar_prefetch = 0 : i64, scratch_operands = 0 : i64, tpu.core_type = #tpu.core_type<tc>, window_params = [{transform_indices = @transform_0, window_bounds = array<i64: 16, 128>}, {pipeline_mode = #tpu.pipeline_mode<synchronous>, transform_indices = @transform_1, window_bounds = array<i64: 128, 256>}, {pipeline_mode = #tpu.pipeline_mode<synchronous>, transform_indices = @transform_2, window_bounds = array<i64: 256, 256>}, {pipeline_mode = #tpu.pipeline_mode<synchronous>, transform_indices = @transform_3, window_bounds = array<i64: 256, 32>}, {pipeline_mode = #tpu.pipeline_mode<synchronous>, transform_indices = @transform_4, window_bounds = array<i64: 3, 256>}, {transform_indices = @transform_5, window_bounds = array<i64: 16, 32>}]} {
    %c0 = arith.constant 0 : index
    %c0_0 = arith.constant 0 : index
    %0 = vector.load %arg1[%c0, %c0_0] : memref<16x128xf32, #tpu.memory_space<vmem>>, vector<16x128xf32>
    %1 = arith.truncf %0 : vector<16x128xf32> to vector<16x128xbf16>
    %c0_1 = arith.constant 0 : index
    %c0_2 = arith.constant 0 : index
    %2 = vector.load %arg5[%c0_1, %c0_2] : memref<3x256xf32, #tpu.memory_space<vmem>>, vector<1x256xf32>
    %c1 = arith.constant 1 : index
    %c0_3 = arith.constant 0 : index
    %3 = vector.load %arg5[%c1, %c0_3] : memref<3x256xf32, #tpu.memory_space<vmem>>, vector<1x256xf32>
    %c2 = arith.constant 2 : index
    %c0_4 = arith.constant 0 : index
    %4 = vector.load %arg5[%c2, %c0_4] : memref<3x256xf32, #tpu.memory_space<vmem>>, vector<1x32xf32>
    %c0_5 = arith.constant 0 : index
    %c0_6 = arith.constant 0 : index
    %5 = vector.load %arg2[%c0_5, %c0_6] : memref<128x256xbf16, #tpu.memory_space<vmem>>, vector<128x256xbf16>
    %cst = arith.constant dense<0.000000e+00> : vector<16x256xf32>
    %6 = tpu.matmul %1, %5, %cst {dimension_numbers = #tpu.dot_dimension_numbers<[1], [0], [0], [1], [0, 0, 1, 1], [], []>} : vector<16x128xbf16>, vector<128x256xbf16>, vector<16x256xf32> -> vector<16x256xf32>
    %7 = vector.broadcast %2 : vector<1x256xf32> to vector<16x256xf32>
    %8 = arith.addf %6, %7 : vector<16x256xf32>
    %cst_7 = arith.constant 0.000000e+00 : f32
    %9 = vector.broadcast %cst_7 : f32 to vector<16x256xf32>
    %10 = arith.maximumf %8, %9 : vector<16x256xf32>
    %11 = arith.truncf %10 : vector<16x256xf32> to vector<16x256xbf16>
    %c0_8 = arith.constant 0 : index
    %c0_9 = arith.constant 0 : index
    %12 = vector.load %arg3[%c0_8, %c0_9] : memref<256x256xbf16, #tpu.memory_space<vmem>>, vector<256x256xbf16>
    %cst_10 = arith.constant dense<0.000000e+00> : vector<16x256xf32>
    %13 = tpu.matmul %11, %12, %cst_10 {dimension_numbers = #tpu.dot_dimension_numbers<[1], [0], [0], [1], [0, 0, 1, 1], [], []>} : vector<16x256xbf16>, vector<256x256xbf16>, vector<16x256xf32> -> vector<16x256xf32>
    %14 = vector.broadcast %3 : vector<1x256xf32> to vector<16x256xf32>
    %15 = arith.addf %13, %14 : vector<16x256xf32>
    %cst_11 = arith.constant 0.000000e+00 : f32
    %16 = vector.broadcast %cst_11 : f32 to vector<16x256xf32>
    %17 = arith.maximumf %15, %16 : vector<16x256xf32>
    %18 = arith.truncf %17 : vector<16x256xf32> to vector<16x256xbf16>
    %c0_12 = arith.constant 0 : index
    %c0_13 = arith.constant 0 : index
    %19 = vector.load %arg4[%c0_12, %c0_13] : memref<256x32xbf16, #tpu.memory_space<vmem>>, vector<256x32xbf16>
    %cst_14 = arith.constant dense<0.000000e+00> : vector<16x32xf32>
    %20 = tpu.matmul %18, %19, %cst_14 {dimension_numbers = #tpu.dot_dimension_numbers<[1], [0], [0], [1], [0, 0, 1, 1], [], []>} : vector<16x256xbf16>, vector<256x32xbf16>, vector<16x32xf32> -> vector<16x32xf32>
    %21 = vector.broadcast %4 : vector<1x32xf32> to vector<16x32xf32>
    %22 = arith.addf %20, %21 : vector<16x32xf32>
    %c0_15 = arith.constant 0 : index
    %c0_16 = arith.constant 0 : index
    %23 = vector.load %arg6[%c0_15, %c0_16] : memref<16x32xf32, #tpu.memory_space<vmem>>, vector<16x32xf32>
    tpu.vector_store %arg6[%c0_15, %c0_16], %22 {strides = array<i32>} : memref<16x32xf32, #tpu.memory_space<vmem>>, vector<16x32xf32>,
    return
  }
  func.func @transform_0(%arg0: i32) -> (i32, i32) {
    %c0_i32 = arith.constant 0 : i32
    %c0_i32_0 = arith.constant 0 : i32
    return %arg0, %c0_i32 : i32, i32
  }
  func.func @transform_1(%arg0: i32) -> (i32, i32) {
    %c0_i32 = arith.constant 0 : i32
    %c0_i32_0 = arith.constant 0 : i32
    %c0_i32_1 = arith.constant 0 : i32
    return %c0_i32, %c0_i32_0 : i32, i32
  }
  func.func @transform_2(%arg0: i32) -> (i32, i32) {
    %c0_i32 = arith.constant 0 : i32
    %c0_i32_0 = arith.constant 0 : i32
    %c0_i32_1 = arith.constant 0 : i32
    return %c0_i32, %c0_i32_0 : i32, i32
  }
  func.func @transform_3(%arg0: i32) -> (i32, i32) {
    %c0_i32 = arith.constant 0 : i32
    %c0_i32_0 = arith.constant 0 : i32
    %c0_i32_1 = arith.constant 0 : i32
    return %c0_i32, %c0_i32_0 : i32, i32
  }
  func.func @transform_4(%arg0: i32) -> (i32, i32) {
    %c0_i32 = arith.constant 0 : i32
    %c0_i32_0 = arith.constant 0 : i32
    %c0_i32_1 = arith.constant 0 : i32
    return %c0_i32, %c0_i32_0 : i32, i32
  }
  func.func @transform_5(%arg0: i32) -> (i32, i32) {
    %c0_i32 = arith.constant 0 : i32
    %c0_i32_0 = arith.constant 0 : i32
    return %arg0, %c0_i32 : i32, i32
  }
}

</mosaic_0001>

<bundles_post_ra>
// kernel: tile.18
= control target key start
LH: loop header
LB: loop body
LE: loop exit
PB: predicated region body
PF: predicated region fallthrough
CT: control target
= control target key end

     0   :  { %s22_s0 = inlined_call_operand.vmem [shape: f32[32], index: 0, kind: input, shape index: {}]   ;;  %s23_s1 = inlined_call_operand.vmem [shape: f32[8,32], index: 1, kind: output, shape index: {}]  }
   0x1   :  { %v4_v0 = vld [vmem:[%s22_s0] ss:$0 sm:$0xff] }
   0x2   :  { %5 = vst [vmem:[%s23_s1] sm:$0xff] %v4_v0 }

// kernel: tile.28
= control target key start
LH: loop header
LB: loop body
LE: loop exit
PB: predicated region body
PF: predicated region fallthrough
CT: control target
= control target key end

     0   :  { %s22_s0 = inlined_call_operand.vmem [shape: f32[4], index: 0, kind: input, shape index: {}]   ;;  %s23_s1 = inlined_call_operand.vmem [shape: f32[8,4], index: 1, kind: output, shape index: {}]  }
   0x1   :  { %v4_v0 = vld [vmem:[%s22_s0] ss:$0 sm:$0xff] }
   0x2   :  { %5 = vst [vmem:[%s23_s1] sm:$0xff] %v4_v0 }

// kernel: deep_snake_forward.1
= control target key start
LH: loop header
LB: loop body
LE: loop exit
PB: predicated region body
PF: predicated region fallthrough
CT: control target
= control target key end

     0   :  { %s1111_s18 = smov 0   ;;  %s1336_s0 = inlined_call_operand.vmem [shape: f32[32,128], index: 0, kind: input, shape index: {}]   ;;  %s1337_s1 = inlined_call_operand.vmem [shape: bf16[128,256], index: 1, kind: input, shape index: {}]   ;;  %s1338_s2 = inlined_call_operand.vmem [shape: bf16[256,256], index: 2, kind: input, shape index: {}]   ;;  %s1339_s3 = inlined_call_operand.vmem [shape: bf16[256,32], index: 3, kind: input, shape index: {}]   ;;  %s1340_s4 = inlined_call_operand.vmem [shape: f32[3,256], index: 4, kind: input, shape index: {}]   ;;  %s1341_s5 = inlined_call_operand.vmem [shape: f32[32,32], index: 5, kind: output, shape index: {}]  }
   0x1 LB: > { %s876_s19 = sadd.s32 4294967295, %s1078_s18   ;;  %p880_p0 = scmp.ge.s32.totalorder %s1078_s18, 1  ;;  %s1078_s18 = sphi %s1111_s18, %s15_s18  }
   0x2   : > { %p188_p1 = scmp.lt.s32.totalorder %s1078_s18, 3 }
   0x4   : > { %p189_p2 = pnand %p880_p0, %p188_p1 }
   0x5   : > { %s881_s9 = sshll.u32 (!%p189_p2), %s876_s19, 1 }
   0x6   : > { %192 = sbr.rel (%p189_p2) target bundleno = 660 (0x294), region = 40  ;;  %p217_p3 = scmp.lt.s32.totalorder (!%p189_p2), %s881_s9, 3 }
   0xb   : > { %v984_v0 = vld [vmem:[%s1337_s1 + $0x74] ss:$8 sps:$4 sm:$0xff]   ;;  %v986_v1 = vld [vmem:[%s1337_s1 + $0x70] ss:$8 sps:$4 sm:$0xff]   ;;  %v1080_v2 = vmov 0   ;;  %s1343_s9 = smov (!%p217_p3, %s881_s9), 3  ;;  %v253_v62 = vlaneseq }
   0xc   : > { %375 = vmatprep.mubr.bf16.mxu0 %v1080_v2  ;;  %343 = vmatprep.subr.bf16.mxu0 %v984_v0  ;;  %v987_v3 = vld [vmem:[%s1337_s1 + $0x64] ss:$8 sps:$4 sm:$0xff]   ;;  %v989_v4 = vld [vmem:[%s1337_s1 + $0x60] ss:$8 sps:$4 sm:$0xff]   ;;  %v990_v5 = vld [vmem:[%s1337_s1 + $0x54] ss:$8 sps:$4 sm:$0xff]  }
   0xd   : > { %344 = vmatpush1.bf16.msra.mxu0 %v986_v1  ;;  %v992_v6 = vld [vmem:[%s1337_s1 + $0x50] ss:$8 sps:$4 sm:$0xff]   ;;  %v993_v7 = vld [vmem:[%s1337_s1 + $0x44] ss:$8 sps:$4 sm:$0xff]   ;;  %v995_v8 = vld [vmem:[%s1337_s1 + $0x40] ss:$8 sps:$4 sm:$0xff]  }
   0xe   : > { %345 = vmatprep.subr.bf16.mxu0 %v987_v3  ;;  %v996_v9 = vld [vmem:[%s1337_s1 + $0x34] ss:$8 sps:$4 sm:$0xff]   ;;  %v1010_v11 = vld [vmem:[%s1338_s2 + $0x70] ss:$8 sps:$4 sm:$0xff]   ;;  %v1011_v12 = vld [vmem:[%s1338_s2 + $0x64] ss:$8 sps:$4 sm:$0xff]  }
   0xf   : > { %v1008_v10 = vld [vmem:[%s1338_s2 + $0x74] ss:$8 sps:$4 sm:$0xff]   ;;  %v998_v13 = vld [vmem:[%s1337_s1 + $0x30] ss:$8 sps:$4 sm:$0xff]   ;;  %v1013_v14 = vld [vmem:[%s1338_s2 + $0x60] ss:$8 sps:$4 sm:$0xff]  }
  0x10   : > { %595 = vmatprep.subr.bf16.mxu1 %v1008_v10  ;;  %v999_v15 = vld [vmem:[%s1337_s1 + $0x24] ss:$8 sps:$4 sm:$0xff]   ;;  %v1014_v16 = vld [vmem:[%s1338_s2 + $0x54] ss:$8 sps:$4 sm:$0xff]   ;;  %v1001_v17 = vld [vmem:[%s1337_s1 + $0x20] ss:$8 sps:$4 sm:$0xff]  }
  0x11   : > { %346 = vmatpush1.bf16.msra.mxu0 %v989_v4  ;;  %596 = vmatpush1.bf16.msra.mxu1 %v1010_v11  ;;  %s882_s6 = sshll.u32 %s1343_s9, 3  ;;  %v1016_v18 = vld [vmem:[%s1338_s2 + $0x50] ss:$8 sps:$4 sm:$0xff]   ;;  %v1002_v19 = vld [vmem:[%s1337_s1 + $0x14] ss:$8 sps:$4 sm:$0xff]   ;;  %v1060_v56 = vld [vmem:[%s1339_s3 + $0x68] sm:$0xff]  }
  0x12   : > { %347 = vmatprep.subr.bf16.mxu0 %v990_v5  ;;  %597 = vmatprep.subr.bf16.mxu1 %v1011_v12  ;;  %v1017_v20 = vld [vmem:[%s1338_s2 + $0x44] ss:$8 sps:$4 sm:$0xff]   ;;  %v1004_v21 = vld [vmem:[%s1337_s1 + $0x10] ss:$8 sps:$4 sm:$0xff]   ;;  %s220_s19 = scalar_lea.vmem %s1336_s0, %s882_s6  ;;  %v1019_v22 = vld [vmem:[%s1338_s2 + $0x40] ss:$8 sps:$4 sm:$0xff]   ;;  %s226_s26 = scalar_lea.vmem %s1341_s5, %s882_s6 }
  0x13   : > { %v1005_v23 = vld [vmem:[%s1337_s1 + $0x4] ss:$8 sps:$4 sm:$0xff]   ;;  %v1020_v24 = vld [vmem:[%s1338_s2 + $0x34] ss:$8 sps:$4 sm:$0xff]   ;;  %v1007_v25 = vld [vmem:[%s1337_s1] ss:$8 sps:$4 sm:$0xff]  }
  0x14   : > { %v229_v26 = vld [vmem:[%s220_s19] sm:$0xff]  ;;  %v230_v27 = vld [vmem:[%s220_s19 + $0x8] sm:$0xff]  ;;  %v1022_v28 = vld [vmem:[%s1338_s2 + $0x30] ss:$8 sps:$4 sm:$0xff]   ;;  %v254_v63 = vshrl.u32 %v253_v62, 7  ;;  %vm817_vm0 = vcmask 261120  }
  0x15   : > { %348 = vmatpush1.bf16.msra.mxu0 %v992_v6  ;;  %598 = vmatpush1.bf16.msra.mxu1 %v1013_v14  ;;  %v1023_v29 = vld [vmem:[%s1338_s2 + $0x24] ss:$8 sps:$4 sm:$0xff]   ;;  %v1025_v30 = vld [vmem:[%s1338_s2 + $0x20] ss:$8 sps:$4 sm:$0xff]   ;;  %v231_v31 = vpack.c.bf16 %v230_v27, %v229_v26  ;;  %v1026_v32 = vld [vmem:[%s1338_s2 + $0x14] ss:$8 sps:$4 sm:$0xff]  }
  0x16   : > { %349 = vmatprep.subr.bf16.mxu0 %v993_v7  ;;  %599 = vmatprep.subr.bf16.mxu1 %v1014_v16  ;;  %v1028_v33 = vld [vmem:[%s1338_s2 + $0x10] ss:$8 sps:$4 sm:$0xff]   ;;  %v1029_v34 = vld [vmem:[%s1338_s2 + $0x4] ss:$8 sps:$4 sm:$0xff]   ;;  %v1031_v35 = vld [vmem:[%s1338_s2] ss:$8 sps:$4 sm:$0xff]  }
  0x17   : > { %v1032_v36 = vld [vmem:[%s1338_s2 + $0xf4] ss:$8 sps:$4 sm:$0xff]   ;;  %v1034_v37 = vld [vmem:[%s1338_s2 + $0xf0] ss:$8 sps:$4 sm:$0xff]   ;;  %v1035_v38 = vld [vmem:[%s1338_s2 + $0xe4] ss:$8 sps:$4 sm:$0xff]  }
  0x18   : > { %v1037_v39 = vld [vmem:[%s1338_s2 + $0xe0] ss:$8 sps:$4 sm:$0xff]   ;;  %v1038_v40 = vld [vmem:[%s1338_s2 + $0xd4] ss:$8 sps:$4 sm:$0xff]   ;;  %v1040_v41 = vld [vmem:[%s1338_s2 + $0xd0] ss:$8 sps:$4 sm:$0xff]  }
  0x19   : > { %350 = vmatpush1.bf16.msra.mxu0 %v995_v8  ;;  %600 = vmatpush1.bf16.msra.mxu1 %v1016_v18  ;;  %v1041_v42 = vld [vmem:[%s1338_s2 + $0xc4] ss:$8 sps:$4 sm:$0xff]   ;;  %v1043_v43 = vld [vmem:[%s1338_s2 + $0xc0] ss:$8 sps:$4 sm:$0xff]   ;;  %v1044_v44 = vld [vmem:[%s1338_s2 + $0xb4] ss:$8 sps:$4 sm:$0xff]  }
  0x1a   : > { %351 = vmatprep.subr.bf16.mxu0 %v996_v9  ;;  %601 = vmatprep.subr.bf16.mxu1 %v1017_v20  ;;  %v1046_v45 = vld [vmem:[%s1338_s2 + $0xb0] ss:$8 sps:$4 sm:$0xff]   ;;  %v1047_v46 = vld [vmem:[%s1338_s2 + $0xa4] ss:$8 sps:$4 sm:$0xff]   ;;  %v1049_v47 = vld [vmem:[%s1338_s2 + $0xa0] ss:$8 sps:$4 sm:$0xff]  }
  0x1b   : > { %v1050_v48 = vld [vmem:[%s1338_s2 + $0x94] ss:$8 sps:$4 sm:$0xff]   ;;  %v1052_v49 = vld [vmem:[%s1338_s2 + $0x90] ss:$8 sps:$4 sm:$0xff]   ;;  %v1053_v50 = vld [vmem:[%s1338_s2 + $0x84] ss:$8 sps:$4 sm:$0xff]  }
  0x1c   : > { %v1055_v51 = vld [vmem:[%s1338_s2 + $0x80] ss:$8 sps:$4 sm:$0xff]   ;;  %v1056_v52 = vld [vmem:[%s1339_s3 + $0x78] sm:$0xff]   ;;  %v1058_v54 = vld [vmem:[%s1339_s3 + $0x70] sm:$0xff]   ;;  %v259_v0 = vsub.s32 1, %v254_v63  ;;  %v255_v1 = vsub.s32 0, %v254_v63 }
  0x1d   : > { %352 = vmatpush1.bf16.msra.mxu0 %v998_v13  ;;  %602 = vmatpush1.bf16.msra.mxu1 %v1019_v22  ;;  %v1057_v53 = vld [vmem:[%s1339_s3 + $0x38] sm:$0xff]   ;;  %v1059_v55 = vld [vmem:[%s1339_s3 + $0x30] sm:$0xff]   ;;  %v1061_v57 = vld [vmem:[%s1339_s3 + $0x28] sm:$0xff]  }
  0x1e   : > { %353 = vmatprep.subr.bf16.mxu0 %v999_v15  ;;  %603 = vmatprep.subr.bf16.mxu1 %v1020_v24  ;;  %v1062_v58 = vld [vmem:[%s1339_s3 + $0x60] sm:$0xff]   ;;  %v1064_v60 = vld [vmem:[%s1339_s3 + $0x58] sm:$0xff]   ;;  %v1067_v20 = vld [vmem:[%s1339_s3 + $0x10] sm:$0xff]  }
  0x1f   : > { %v1063_v59 = vld [vmem:[%s1339_s3 + $0x20] sm:$0xff]   ;;  %v1065_v61 = vld [vmem:[%s1339_s3 + $0x18] sm:$0xff]   ;;  %v1069_v22 = vld [vmem:[%s1339_s3 + $0x8] sm:$0xff]  }
  0x20   : > { %v232_v2 = vld [vmem:[%s1340_s4] ss:$4 sm:$0x3] }
  0x21   : > { %354 = vmatpush1.bf16.msra.mxu0 %v1001_v17  ;;  %604 = vmatpush1.bf16.msra.mxu1 %v1022_v28  ;;  %v260_v4 = vrot.slane %v232_v2, %v259_v0  ;;  %v256_v5 = vrot.slane %v232_v2, %v255_v1  ;;  %v1071_v24 = vld [vmem:[%s1339_s3] sm:$0xff]  }
  0x22   : > { %355 = vmatprep.subr.bf16.mxu0 %v1002_v19  ;;  %605 = vmatprep.subr.bf16.mxu1 %v1023_v29  ;;  %v1066_v19 = vld [vmem:[%s1339_s3 + $0x50] sm:$0xff]  }
  0x25   : > { %356 = vmatpush1.bf16.msra.mxu0 %v1004_v21  ;;  %606 = vmatpush1.bf16.msra.mxu1 %v1025_v30  ;;  %v1068_v21 = vld [vmem:[%s1339_s3 + $0x48] sm:$0xff]  }
  0x26   : > { %357 = vmatprep.subr.bf16.mxu0 %v1005_v23  ;;  %607 = vmatprep.subr.bf16.mxu1 %v1026_v32  ;;  %v1070_v23 = vld [vmem:[%s1339_s3 + $0x40] sm:$0xff]  }
  0x29   : > { %358 = vmatpush1.bf16.msra.mxu0 %v1007_v25  ;;  %608 = vmatpush1.bf16.msra.mxu1 %v1028_v33  ;;  %v885_v25 = vld [vmem:[%s1340_s4 + $0x1] ss:$4 sm:$0x3] }
  0x2a   : > { %609 = vmatprep.subr.bf16.mxu1 %v1029_v34  ;;  %953 = vmatprep.subr.bf16.mxu0 %v1056_v52  ;;  %v432_v27 = vrot.slane %v885_v25, %v259_v0  ;;  %v428_v28 = vrot.slane %v885_v25, %v255_v1 }
  0x2c   : > { %376 = vmatmul.mubr.bf16.vlgmr.msra.gmra.mxu0 %v231_v31 }
  0x2d   : > { %610 = vmatpush1.bf16.msra.mxu1 %v1031_v35  ;;  %954 = vmatpush3.bf16.msra.mxu0 %v1057_v53 }
  0x2e   : > { %611 = vmatprep.subr.bf16.mxu1 %v1032_v36  ;;  %955 = vmatprep.subr.bf16.mxu0 %v1058_v54 }
  0x31   : > { %612 = vmatpush2.bf16.msra.mxu1 %v1034_v37  ;;  %956 = vmatpush3.bf16.msra.mxu0 %v1059_v55 }
  0x32   : > { %613 = vmatprep.subr.bf16.mxu1 %v1035_v38  ;;  %957 = vmatprep.subr.bf16.mxu0 %v1060_v56 }
  0x35   : > { %614 = vmatpush2.bf16.msra.mxu1 %v1037_v39  ;;  %958 = vmatpush3.bf16.msra.mxu0 %v1061_v57 }
  0x36   : > { %615 = vmatprep.subr.bf16.mxu1 %v1038_v40  ;;  %959 = vmatprep.subr.bf16.mxu0 %v1062_v58 }
  0x39   : > { %616 = vmatpush2.bf16.msra.mxu1 %v1040_v41  ;;  %960 = vmatpush3.bf16.msra.mxu0 %v1063_v59 }
  0x3a   : > { %617 = vmatprep.subr.bf16.mxu1 %v1041_v42  ;;  %961 = vmatprep.subr.bf16.mxu0 %v1064_v60 }
  0x3d   : > { %618 = vmatpush2.bf16.msra.mxu1 %v1043_v43  ;;  %962 = vmatpush3.bf16.msra.mxu0 %v1065_v61  ;;  %v934_v43 = vld [vmem:[%s1340_s4 + $0x2] ss:$0 sm:$0xff] }
  0x3e   : > { %619 = vmatprep.subr.bf16.mxu1 %v1044_v44  ;;  %963 = vmatprep.subr.bf16.mxu0 %v1066_v19 }
  0x41   : > { %620 = vmatpush2.bf16.msra.mxu1 %v1046_v45  ;;  %964 = vmatpush3.bf16.msra.mxu0 %v1067_v20 }
  0x42   : > { %621 = vmatprep.subr.bf16.mxu1 %v1047_v46  ;;  %965 = vmatprep.subr.bf16.mxu0 %v1068_v21 }
  0x45   : > { %622 = vmatpush2.bf16.msra.mxu1 %v1049_v47  ;;  %966 = vmatpush3.bf16.msra.mxu0 %v1069_v22 }
  0x46   : > { %623 = vmatprep.subr.bf16.mxu1 %v1050_v48  ;;  %967 = vmatprep.subr.bf16.mxu0 %v1070_v23 }
  0x49   : > { %624 = vmatpush2.bf16.msra.mxu1 %v1052_v49  ;;  %968 = vmatpush3.bf16.msra.mxu0 %v1071_v24 }
  0x4a   : > { %625 = vmatprep.subr.bf16.mxu1 %v1053_v50 }
  0x4d   : > { %626 = vmatpush2.bf16.msra.mxu1 %v1055_v51 }
  0xec   : > { %v377_v3 = vpop.f32.mrf.mxu0 }
  0xed   : > { %v378_v10 = vadd.f32 %v377_v3, %v256_v5 }
  0xee   : > { %v379_v6 = vpop.f32.mrf.mxu0 }
  0xef   : > { %v380_v8 = vadd.f32 %v379_v6, %v260_v4  ;;  %v386_v16 = vmax.f32 %v378_v10, 0.0 }
  0xf0   : > { %v381_v7 = vpop.f32.mrf.mxu0 }
  0xf1   : > { %v382_v9 = vadd.f32 %v381_v7, %v256_v5  ;;  %v387_v14 = vmax.f32 %v380_v8, 0.0 }
  0xf2   : > { %v383_v11 = vpop.f32.mrf.mxu0 }
  0xf3   : > { %v384_v12 = vadd.f32 %v383_v11, %v260_v4  ;;  %v388_v13 = vmax.f32 %v382_v9, 0.0 }
  0xf5   : > { %v389_v15 = vmax.f32 %v384_v12, 0.0  ;;  %v390_v18 = vpack.c.bf16 %v388_v13, %v386_v16 }
  0xf7   : > { %v391_v17 = vpack.c.bf16 %v389_v15, %v387_v14 }
  0xf9   : > { %627 = vmatprep.mubr.bf16.mxu1 %v391_v17 }
  0xfa   : > { %628 = vmatmul.mubr.bf16.vlgmr.msra.gmra.mxu1 %v390_v18 }
 0x1ba   : > { %v629_v26 = vpop.f32.mrf.mxu1 }
 0x1bb   : > { %v630_v33 = vadd.f32 %v629_v26, %v428_v28 }
 0x1bc   : > { %v631_v29 = vpop.f32.mrf.mxu1 }
 0x1bd   : > { %v632_v31 = vadd.f32 %v631_v29, %v432_v27  ;;  %v638_v39 = vmax.f32 %v630_v33, 0.0 }
 0x1be   : > { %v633_v30 = vpop.f32.mrf.mxu1 }
 0x1bf   : > { %v634_v32 = vadd.f32 %v633_v30, %v428_v28  ;;  %v639_v37 = vmax.f32 %v632_v31, 0.0 }
 0x1c0   : > { %v635_v34 = vpop.f32.mrf.mxu1 }
 0x1c1   : > { %v636_v35 = vadd.f32 %v635_v34, %v432_v27  ;;  %v640_v36 = vmax.f32 %v634_v32, 0.0 }
 0x1c3   : > { %v641_v38 = vmax.f32 %v636_v35, 0.0  ;;  %v642_v41 = vpack.c.bf16 %v640_v36, %v638_v39 }
 0x1c5   : > { %v643_v40 = vpack.c.bf16 %v641_v38, %v639_v37 }
 0x1c7   : > { %808 = vmatprep.mubr.bf16.mxu0 %v643_v40 }
 0x1c8   : > { %809 = vmatmul.mubr.bf16.vlgmr.msra.gmra.mxu0 %v642_v41 }
 0x288   : > { %v969_v42 = vpop.f32.mrf.mxu0 }
 0x28a   : > { %v970_v44 = vpop.f32.mrf.mxu0 }
 0x28b   : > { %v971_v45 = vadd.f32 %v970_v44, %v969_v42 }
 0x28c   : > { %v972_v46 = vpop.f32.mrf.mxu0 }
 0x28d   : > { %v811_v47 = vadd.f32 %v971_v45, %v934_v43 }
 0x28e   : > { %v973_v48 = vpop.f32.mrf.mxu0 }
 0x28f   : > { %818 = vst.msk [vmem:[%s226_s26] sm:$0xff] %vm817_vm0, %v811_v47  ;;  %v974_v49 = vadd.f32 %v973_v48, %v972_v46 }
 0x291   : > { %v814_v50 = vadd.f32 %v974_v49, %v934_v43 }
 0x293   : > { %819 = vst.msk [vmem:[%s226_s26 + $0x8] sm:$0xff] %vm817_vm0, %v814_v50 }
 0x294 PF: > { %s15_s18 = sadd.s32 1, %s1078_s18  }
 0x295   : > { %p12_p4 = scmp.ge.s32.totalorder %s15_s18, 4  }
 0x297   :  { %14 = sbr.rel (!%p12_p4) target bundleno = 1 (0x1), region = 71 }

</bundles_post_ra>
